<compile_context>
chip_gen: v5e
topology: v5e:2x2
jax: 0.10.0
libtpu: 0.0.40
codegen_flags: <defaults>
</compile_context>

<pallas_src>
import functools

import jax
import jax.numpy as jnp
from jax.experimental import pallas as pl
from jax.experimental.pallas import tpu as pltpu

EPS = 1e-5
LANES = 128


def _round_up(x, m):
    return (x + m - 1) // m * m


def _vmem_limit_bytes():
    """Generation-aware VMEM scope: ~48 MiB on v7x (64 MiB physical), ~100 MiB on v5e/v6e."""
    cap = 64 * 1024 * 1024
    try:
        info = pltpu.get_tpu_info()
        cap = int(getattr(info, "vmem_capacity_bytes", cap))
    except Exception:
        pass
    return int(min(cap - 16 * 1024 * 1024, 100 * 1024 * 1024))


# --------------------------------------------------------------------------
# Phase 1: tiled (A @ H) accumulated directly into the lane-dense f32 output
# block, plus per-row-tile BatchNorm partial statistics.
# --------------------------------------------------------------------------
def agg_stats_kernel(a_ref, h_ref, agg_ref, psum_ref, psq_ref, *, tk, h_resident):
    k = pl.program_id(1)

    @pl.when(k == 0)
    def _():
        agg_ref[...] = jnp.zeros_like(agg_ref)

    if h_resident:
        # H is a single VMEM-resident slab (constant block index); slice the
        # current contraction strip.
        kk = pl.multiple_of(k * tk, tk)
        h_blk = h_ref[pl.ds(kk, tk), :]
    else:
        h_blk = h_ref[...]

    # bf16 x bf16 on the MXU, f32 accumulation directly in the output block.
    agg_ref[...] += jnp.dot(a_ref[...], h_blk, preferred_element_type=jnp.float32)

    @pl.when(k == pl.num_programs(1) - 1)
    def _():
        # Padded rows of A are zero, so padded rows of agg contribute nothing;
        # the wrapper divides by the true N.
        acc = agg_ref[...]
        psum_ref[0] = jnp.sum(acc, axis=0, keepdims=True)
        psq_ref[0] = jnp.sum(acc * acc, axis=0, keepdims=True)


# --------------------------------------------------------------------------
# Phase 2: fused BatchNorm affine (pre-folded scale/shift) + ReLU, lane-dense.
# --------------------------------------------------------------------------
def bn_relu_kernel(agg_ref, scale_ref, shift_ref, o_ref):
    o_ref[...] = jnp.maximum(
        agg_ref[...] * scale_ref[...] + shift_ref[...], 0.0
    ).astype(o_ref.dtype)


def build_normalized_adjacency(pos_edge_index, neg_edge_index, num_nodes,
                               rows=None, cols=None, dtype=jnp.float32):
    """Dense D^{-1/2} (A + I) D^{-1/2} matching gcn_norm with add_self_loops.

    Scatters directly into a (rows, cols) buffer (rows/cols >= num_nodes) and
    fuses the normalization scaling with the final dtype cast, so padding /
    casting do not add extra full-size passes.
    """
    rows = num_nodes if rows is None else rows
    cols = num_nodes if cols is None else cols

    edge_index = jnp.concatenate([pos_edge_index, neg_edge_index], axis=1)
    w_pos = jnp.ones((pos_edge_index.shape[1],), jnp.float32)
    w_neg = jnp.zeros((neg_edge_index.shape[1],), jnp.float32)
    weights = jnp.concatenate([w_pos, w_neg])

    src = edge_index[0]
    dst = edge_index[1]
    # add_remaining_self_loops: drop existing self loops, re-add with weight 1.
    weights = jnp.where(src == dst, 0.0, weights)

    adj = jnp.zeros((rows, cols), jnp.float32)
    adj = adj.at[dst, src].add(weights)                    # A[target, source]
    diag = jnp.arange(num_nodes)
    adj = adj.at[diag, diag].add(1.0)

    deg = adj.sum(axis=1)                                  # per-target degree
    deg_inv_sqrt = jnp.where(deg > 0, jax.lax.rsqrt(deg), 0.0)
    dis_cols = jnp.zeros((cols,), jnp.float32).at[:num_nodes].set(
        deg_inv_sqrt[:num_nodes])
    return (deg_inv_sqrt[:, None] * adj * dis_cols[None, :]).astype(dtype)


@functools.partial(jax.jit, static_argnames=("num_nodes",))
def gcn_block_forward(x, pos_edge_index, neg_edge_index, params, num_nodes):
    w_t, _bias, gamma, beta = params   # GCNConv bias cancels under BatchNorm -> dropped
    n = num_nodes
    c_out = w_t.shape[1]
    c_pad = _round_up(c_out, LANES)               # lane-dense everywhere

    # ---- tile selection / independent row & contraction padding ------------
    tm = 512 if n >= 1024 else 128                # output row tile
    tk = 2048 if n >= 4096 else (512 if n >= 1024 else 128)   # A contraction tile
    n_pad_m = _round_up(n, tm)
    n_pad_k = _round_up(n, tk)
    num_row_tiles = n_pad_m // tm
    num_k_tiles = n_pad_k // tk

    vmem_limit = _vmem_limit_bytes()

    # ---- operands -----------------------------------------------------------
    a_pad = build_normalized_adjacency(
        pos_edge_index, neg_edge_index, n,
        rows=n_pad_m, cols=n_pad_k, dtype=jnp.bfloat16)

    # H = X @ W^T once (tiny matmul), streamed lane-dense in bf16.
    hi = jax.lax.Precision.HIGHEST
    h = jnp.dot(x, w_t, precision=hi)                       # (n, c_out) f32
    h_pad = jnp.zeros((n_pad_k, c_pad), jnp.bfloat16).at[:n, :c_out].set(
        h.astype(jnp.bfloat16))

    gamma_pad = jnp.zeros((c_pad,), jnp.float32).at[:c_out].set(gamma)
    beta_pad = jnp.zeros((c_pad,), jnp.float32).at[:c_out].set(beta)

    # Keep H fully VMEM-resident (single fetch) unless it would be too large.
    h_resident = n_pad_k * c_pad * 2 * 2 <= 16 * 1024 * 1024
    if h_resident:
        h_spec = pl.BlockSpec((n_pad_k, c_pad), lambda i, k: (0, 0))
    else:
        h_spec = pl.BlockSpec((tk, c_pad), lambda i, k: (k, 0))

    kernel1 = functools.partial(agg_stats_kernel, tk=tk, h_resident=h_resident)

    # ---- phase 1: aggregation + partial BN stats ---------------------------
    agg, psum, psq = pl.pallas_call(
        kernel1,
        out_shape=(
            jax.ShapeDtypeStruct((n_pad_m, c_pad), jnp.float32),
            jax.ShapeDtypeStruct((num_row_tiles, 1, c_pad), jnp.float32),
            jax.ShapeDtypeStruct((num_row_tiles, 1, c_pad), jnp.float32),
        ),
        grid_spec=pltpu.PrefetchScalarGridSpec(
            num_scalar_prefetch=0,
            grid=(num_row_tiles, num_k_tiles),
            in_specs=[
                pl.BlockSpec((tm, tk), lambda i, k: (i, k)),      # A (bf16)
                h_spec,                                           # H (bf16)
            ],
            out_specs=(
                pl.BlockSpec((tm, c_pad), lambda i, k: (i, 0)),       # agg
                pl.BlockSpec((1, 1, c_pad), lambda i, k: (i, 0, 0)),  # sum
                pl.BlockSpec((1, 1, c_pad), lambda i, k: (i, 0, 0)),  # sumsq
            ),
        ),
        compiler_params=pltpu.CompilerParams(
            dimension_semantics=("parallel", "arbitrary"),
            vmem_limit_bytes=vmem_limit,
        ),
    )(a_pad, h_pad)

    # ---- tiny per-channel combine (true N, excluding padded rows) ----------
    n_f = jnp.float32(n)
    mean = jnp.sum(psum[:, 0, :], axis=0) / n_f
    var = jnp.maximum(jnp.sum(psq[:, 0, :], axis=0) / n_f - mean * mean, 0.0)
    inv_std = jax.lax.rsqrt(var + EPS)
    # Padded channels have var=0 -> inv_std ~ 1/sqrt(eps) (finite); gamma_pad /
    # beta_pad / mean are exactly zero there so scale/shift stay 0 (no inf/NaN).
    scale = (gamma_pad * inv_std).reshape(1, c_pad)           # fold gamma*inv_std
    shift = (beta_pad - mean * gamma_pad * inv_std).reshape(1, c_pad)

    # ---- phase 2: lane-dense BN affine + ReLU (its own larger row tile) ----
    tm2 = next(c for c in (2048, 1024, 512, 256, 128) if n_pad_m % c == 0)
    out_pad = pl.pallas_call(
        bn_relu_kernel,
        out_shape=jax.ShapeDtypeStruct((n_pad_m, c_pad), jnp.float32),
        grid_spec=pltpu.PrefetchScalarGridSpec(
            num_scalar_prefetch=0,
            grid=(n_pad_m // tm2,),
            in_specs=[
                pl.BlockSpec((tm2, c_pad), lambda i: (i, 0)),
                pl.BlockSpec((1, c_pad), lambda i: (0, 0)),
                pl.BlockSpec((1, c_pad), lambda i: (0, 0)),
            ],
            out_specs=pl.BlockSpec((tm2, c_pad), lambda i: (i, 0)),
        ),
        compiler_params=pltpu.CompilerParams(
            dimension_semantics=("parallel",),
            vmem_limit_bytes=vmem_limit,
        ),
    )(agg, scale, shift)

    return out_pad[:n, :c_out]


def init_params(key, in_dims, out_dims):
    # GCNConv linear weight: [out_dims, in_dims], glorot uniform; bias zeros.
    limit = jnp.sqrt(6.0 / (in_dims + out_dims))
    w = jax.random.uniform(key, (out_dims, in_dims), jnp.float32, -limit, limit)
    w_t = w.T                                   # [in_dims, out_dims]
    bias = jnp.zeros((out_dims,), jnp.float32)
    gamma = jnp.ones((out_dims,), jnp.float32)  # BatchNorm1d affine params
    beta = jnp.zeros((out_dims,), jnp.float32)
    return (w_t, bias, gamma, beta)


def reference_forward(x, pos_edge_index, neg_edge_index, params, num_nodes):
    """Pure-JAX reference; A and H=X@W^T quantized to bf16 like the kernel inputs."""
    w_t, bias, gamma, beta = params
    a = build_normalized_adjacency(pos_edge_index, neg_edge_index, num_nodes)
    aq = a.astype(jnp.bfloat16).astype(jnp.float32)
    hi = jax.lax.Precision.HIGHEST
    h = jnp.dot(x, w_t, precision=hi)
    hq = h.astype(jnp.bfloat16).astype(jnp.float32)
    out = jnp.dot(aq, hq, precision=hi) + bias[None, :]
    mean = out.mean(0, keepdims=True)
    var = ((out - mean) ** 2).mean(0, keepdims=True)
    y = gamma[None, :] * (out - mean) / jnp.sqrt(var + EPS) + beta[None, :]
    return jnp.maximum(y, 0.0)


if __name__ == "__main__":
    N, IN_DIMS, OUT_DIMS = 200, 8, 32           # exercises padding + 2x2 grid
    E_POS, E_NEG = 400, 160

    key = jax.random.PRNGKey(0)
    k_x, k_w, k_pe, k_ne = jax.random.split(key, 4)

    x = jax.random.normal(k_x, (N, IN_DIMS), jnp.float32)
    pos_edge_index = jax.random.randint(k_pe, (2, E_POS), 0, N, dtype=jnp.int32)
    neg_edge_index = jax.random.randint(k_ne, (2, E_NEG), 0, N, dtype=jnp.int32)
    params = init_params(k_w, IN_DIMS, OUT_DIMS)

    out = gcn_block_forward(x, pos_edge_index, neg_edge_index, params, N)
    out = jax.block_until_ready(out)

    ref = reference_forward(x, pos_edge_index, neg_edge_index, params, N)
    assert out.shape == (N, OUT_DIMS)
    assert jnp.allclose(out, ref, atol=2e-2, rtol=2e-2), float(
        jnp.abs(out - ref).max())

    print("KERNEL_OK")
</pallas_src>

<mosaic_0001>
module attributes {stable_mosaic.version = 11 : i64} {
  func.func @agg_stats_kernel(%arg0: i32, %arg1: i32, %arg2: memref<128x128xbf16, #tpu.memory_space<vmem>>, %arg3: memref<256x128xbf16, #tpu.memory_space<vmem>>, %arg4: memref<128x128xf32, #tpu.memory_space<vmem>>, %arg5: memref<1x1x128xf32, #tpu.memory_space<vmem>>, %arg6: memref<1x1x128xf32, #tpu.memory_space<vmem>>) attributes {dimension_semantics = [#tpu.dimension_semantics<parallel>, #tpu.dimension_semantics<arbitrary>], iteration_bounds = array<i64: 2, 2>, scalar_prefetch = 0 : i64, scratch_operands = 0 : i64, tpu.core_type = #tpu.core_type<tc>, window_params = [{transform_indices = @transform_0, window_bounds = array<i64: 128, 128>}, {pipeline_mode = #tpu.pipeline_mode<synchronous>, transform_indices = @transform_1, window_bounds = array<i64: 256, 128>}, {transform_indices = @transform_2, window_bounds = array<i64: 128, 128>}, {transform_indices = @transform_3, window_bounds = array<i64: 1, 1, 128>}, {transform_indices = @transform_4, window_bounds = array<i64: 1, 1, 128>}]} {
    %c0_i32 = arith.constant 0 : i32
    %0 = arith.cmpi eq, %arg1, %c0_i32 : i32
    %1 = arith.extui %0 : i1 to i32
    %c0_i32_0 = arith.constant 0 : i32
    %2 = arith.cmpi ne, %1, %c0_i32_0 : i32
    scf.if %2 {
      %cst_8 = arith.constant 0.000000e+00 : f32
      %15 = vector.broadcast %cst_8 : f32 to vector<128x128xf32>
      %c0_9 = arith.constant 0 : index
      %c0_10 = arith.constant 0 : index
      %16 = vector.load %arg4[%c0_9, %c0_10] : memref<128x128xf32, #tpu.memory_space<vmem>>, vector<128x128xf32>
      tpu.vector_store %arg4[%c0_9, %c0_10], %15 {strides = array<i32>} : memref<128x128xf32, #tpu.memory_space<vmem>>, vector<128x128xf32>,
    } else {
    }
    %c128_i32 = arith.constant 128 : i32
    %3 = arith.muli %arg1, %c128_i32 : i32
    %4 = tpu.assume_multiple %3, 128 : i32
    %5 = arith.index_cast %4 : i32 to index
    %c0 = arith.constant 0 : index
    %6 = vector.load %arg3[%5, %c0] : memref<256x128xbf16, #tpu.memory_space<vmem>>, vector<128x128xbf16>
    %c0_1 = arith.constant 0 : index
    %c0_2 = arith.constant 0 : index
    %7 = vector.load %arg4[%c0_1, %c0_2] : memref<128x128xf32, #tpu.memory_space<vmem>>, vector<128x128xf32>
    %c0_3 = arith.constant 0 : index
    %c0_4 = arith.constant 0 : index
    %8 = vector.load %arg2[%c0_3, %c0_4] : memref<128x128xbf16, #tpu.memory_space<vmem>>, vector<128x128xbf16>
    %cst = arith.constant dense<0.000000e+00> : vector<128x128xf32>
    %9 = tpu.matmul %8, %6, %cst {dimension_numbers = #tpu.dot_dimension_numbers<[1], [0], [0], [1], [0, 0, 1, 1], [], []>} : vector<128x128xbf16>, vector<128x128xbf16>, vector<128x128xf32> -> vector<128x128xf32>
    %10 = arith.addf %7, %9 : vector<128x128xf32>
    %c0_5 = arith.constant 0 : index
    %c0_6 = arith.constant 0 : index
    %11 = vector.load %arg4[%c0_5, %c0_6] : memref<128x128xf32, #tpu.memory_space<vmem>>, vector<128x128xf32>
    tpu.vector_store %arg4[%c0_5, %c0_6], %10 {strides = array<i32>} : memref<128x128xf32, #tpu.memory_space<vmem>>, vector<128x128xf32>,
    %c1_i32 = arith.constant 1 : i32
    %12 = arith.cmpi eq, %arg1, %c1_i32 : i32
    %13 = arith.extui %12 : i1 to i32
    %c0_i32_7 = arith.constant 0 : i32
    %14 = arith.cmpi ne, %13, %c0_i32_7 : i32
    scf.if %14 {
      %c0_8 = arith.constant 0 : index
      %c0_9 = arith.constant 0 : index
      %15 = vector.load %arg4[%c0_8, %c0_9] : memref<128x128xf32, #tpu.memory_space<vmem>>, vector<128x128xf32>
      %cst_10 = arith.constant dense<0.000000e+00> : vector<128xf32>
      %16 = vector.multi_reduction <add>, %15, %cst_10 [0] : vector<128x128xf32> to vector<128xf32>
      %17 = vector.shape_cast %16 : vector<128xf32> to vector<1x128xf32>
      %c0_11 = arith.constant 0 : index
      %c0_12 = arith.constant 0 : index
      %c0_13 = arith.constant 0 : index
      %18 = vector.load %arg5[%c0_11, %c0_12, %c0_13] : memref<1x1x128xf32, #tpu.memory_space<vmem>>, vector<1x1x128xf32>
      %19 = vector.shape_cast %18 : vector<1x1x128xf32> to vector<1x128xf32>
      %20 = vector.shape_cast %17 : vector<1x128xf32> to vector<1x1x128xf32>
      tpu.vector_store %arg5[%c0_11, %c0_12, %c0_13], %20 {strides = array<i32>} : memref<1x1x128xf32, #tpu.memory_space<vmem>>, vector<1x1x128xf32>,
      %21 = arith.mulf %15, %15 : vector<128x128xf32>
      %cst_14 = arith.constant dense<0.000000e+00> : vector<128xf32>
      %22 = vector.multi_reduction <add>, %21, %cst_14 [0] : vector<128x128xf32> to vector<128xf32>
      %23 = vector.shape_cast %22 : vector<128xf32> to vector<1x128xf32>
      %c0_15 = arith.constant 0 : index
      %c0_16 = arith.constant 0 : index
      %c0_17 = arith.constant 0 : index
      %24 = vector.load %arg6[%c0_15, %c0_16, %c0_17] : memref<1x1x128xf32, #tpu.memory_space<vmem>>, vector<1x1x128xf32>
      %25 = vector.shape_cast %24 : vector<1x1x128xf32> to vector<1x128xf32>
      %26 = vector.shape_cast %23 : vector<1x128xf32> to vector<1x1x128xf32>
      tpu.vector_store %arg6[%c0_15, %c0_16, %c0_17], %26 {strides = array<i32>} : memref<1x1x128xf32, #tpu.memory_space<vmem>>, vector<1x1x128xf32>,
    } else {
    }
    return
  }
  func.func @transform_0(%arg0: i32, %arg1: i32) -> (i32, i32) {
    %c0_i32 = arith.constant 0 : i32
    return %arg0, %arg1 : i32, i32
  }
  func.func @transform_1(%arg0: i32, %arg1: i32) -> (i32, i32) {
    %c0_i32 = arith.constant 0 : i32
    %c0_i32_0 = arith.constant 0 : i32
    %c0_i32_1 = arith.constant 0 : i32
    return %c0_i32, %c0_i32_0 : i32, i32
  }
  func.func @transform_2(%arg0: i32, %arg1: i32) -> (i32, i32) {
    %c0_i32 = arith.constant 0 : i32
    %c0_i32_0 = arith.constant 0 : i32
    return %arg0, %c0_i32 : i32, i32
  }
  func.func @transform_3(%arg0: i32, %arg1: i32) -> (i32, i32, i32) {
    %c0_i32 = arith.constant 0 : i32
    %c0_i32_0 = arith.constant 0 : i32
    %c0_i32_1 = arith.constant 0 : i32
    return %arg0, %c0_i32, %c0_i32_0 : i32, i32, i32
  }
  func.func @transform_4(%arg0: i32, %arg1: i32) -> (i32, i32, i32) {
    %c0_i32 = arith.constant 0 : i32
    %c0_i32_0 = arith.constant 0 : i32
    %c0_i32_1 = arith.constant 0 : i32
    return %arg0, %c0_i32, %c0_i32_0 : i32, i32, i32
  }
}

module attributes {stable_mosaic.version = 11 : i64} {
  func.func @bn_relu_kernel(%arg0: i32, %arg1: memref<256x128xf32, #tpu.memory_space<vmem>>, %arg2: memref<1x128xf32, #tpu.memory_space<vmem>>, %arg3: memref<1x128xf32, #tpu.memory_space<vmem>>, %arg4: memref<256x128xf32, #tpu.memory_space<vmem>>) attributes {dimension_semantics = [#tpu.dimension_semantics<parallel>], iteration_bounds = array<i64: 1>, scalar_prefetch = 0 : i64, scratch_operands = 0 : i64, tpu.core_type = #tpu.core_type<tc>, window_params = [{transform_indices = @transform_0, window_bounds = array<i64: 256, 128>}, {pipeline_mode = #tpu.pipeline_mode<synchronous>, transform_indices = @transform_1, window_bounds = array<i64: 1, 128>}, {pipeline_mode = #tpu.pipeline_mode<synchronous>, transform_indices = @transform_2, window_bounds = array<i64: 1, 128>}, {transform_indices = @transform_3, window_bounds = array<i64: 256, 128>}]} {
    %c0 = arith.constant 0 : index
    %c0_0 = arith.constant 0 : index
    %0 = vector.load %arg1[%c0, %c0_0] : memref<256x128xf32, #tpu.memory_space<vmem>>, vector<256x128xf32>
    %c0_1 = arith.constant 0 : index
    %c0_2 = arith.constant 0 : index
    %1 = vector.load %arg2[%c0_1, %c0_2] : memref<1x128xf32, #tpu.memory_space<vmem>>, vector<1x128xf32>
    %2 = vector.broadcast %1 : vector<1x128xf32> to vector<256x128xf32>
    %3 = arith.mulf %0, %2 : vector<256x128xf32>
    %c0_3 = arith.constant 0 : index
    %c0_4 = arith.constant 0 : index
    %4 = vector.load %arg3[%c0_3, %c0_4] : memref<1x128xf32, #tpu.memory_space<vmem>>, vector<1x128xf32>
    %5 = vector.broadcast %4 : vector<1x128xf32> to vector<256x128xf32>
    %6 = arith.addf %3, %5 : vector<256x128xf32>
    %cst = arith.constant 0.000000e+00 : f32
    %7 = vector.broadcast %cst : f32 to vector<256x128xf32>
    %8 = arith.maximumf %6, %7 : vector<256x128xf32>
    %c0_5 = arith.constant 0 : index
    %c0_6 = arith.constant 0 : index
    %9 = vector.load %arg4[%c0_5, %c0_6] : memref<256x128xf32, #tpu.memory_space<vmem>>, vector<256x128xf32>
    tpu.vector_store %arg4[%c0_5, %c0_6], %8 {strides = array<i32>} : memref<256x128xf32, #tpu.memory_space<vmem>>, vector<256x128xf32>,
    return
  }
  func.func @transform_0(%arg0: i32) -> (i32, i32) {
    %c0_i32 = arith.constant 0 : i32
    %c0_i32_0 = arith.constant 0 : i32
    return %arg0, %c0_i32 : i32, i32
  }
  func.func @transform_1(%arg0: i32) -> (i32, i32) {
    %c0_i32 = arith.constant 0 : i32
    %c0_i32_0 = arith.constant 0 : i32
    %c0_i32_1 = arith.constant 0 : i32
    return %c0_i32, %c0_i32_0 : i32, i32
  }
  func.func @transform_2(%arg0: i32) -> (i32, i32) {
    %c0_i32 = arith.constant 0 : i32
    %c0_i32_0 = arith.constant 0 : i32
    %c0_i32_1 = arith.constant 0 : i32
    return %c0_i32, %c0_i32_0 : i32, i32
  }
  func.func @transform_3(%arg0: i32) -> (i32, i32) {
    %c0_i32 = arith.constant 0 : i32
    %c0_i32_0 = arith.constant 0 : i32
    return %arg0, %c0_i32 : i32, i32
  }
}

</mosaic_0001>

<bundles_post_ra>
// kernel: gcn_block_forward.3
= control target key start
LH: loop header
LB: loop body
LE: loop exit
PB: predicated region body
PF: predicated region fallthrough
CT: control target
= control target key end

     0   :  { %s474_s0 = inlined_call_operand.vmem [shape: f32[256,128], index: 0, kind: input, shape index: {}]   ;;  %s475_s1 = inlined_call_operand.vmem [shape: f32[1,128], index: 1, kind: input, shape index: {}]   ;;  %s476_s2 = inlined_call_operand.vmem [shape: f32[1,128], index: 2, kind: input, shape index: {}]   ;;  %s477_s3 = inlined_call_operand.vmem [shape: f32[256,128], index: 3, kind: output, shape index: {}]  }
   0x1   :  { %v14_v0 = vld [vmem:[%s474_s0] sm:$0xff]  ;;  %v15_v3 = vld [vmem:[%s474_s0 + $0x8] sm:$0xff]  ;;  %v16_v6 = vld [vmem:[%s474_s0 + $0x10] sm:$0xff] }
   0x2   :  { %v214_v1 = vld [vmem:[%s475_s1] ss:$0 sm:$0xff]  ;;  %v17_v7 = vld [vmem:[%s474_s0 + $0x18] sm:$0xff]  ;;  %v19_v12 = vld [vmem:[%s474_s0 + $0x28] sm:$0xff] }
   0x3   :  { %v219_v2 = vld [vmem:[%s476_s2] ss:$0 sm:$0xff]  ;;  %v50_v4 = vmul.f32 %v214_v1, %v14_v0  ;;  %v51_v5 = vmul.f32 %v214_v1, %v15_v3  ;;  %v52_v9 = vmul.f32 %v214_v1, %v16_v6  ;;  %v53_v10 = vmul.f32 %v214_v1, %v17_v7  ;;  %v20_v13 = vld [vmem:[%s474_s0 + $0x30] sm:$0xff]  ;;  %v21_v14 = vld [vmem:[%s474_s0 + $0x38] sm:$0xff] }
   0x4   :  { %v18_v8 = vld [vmem:[%s474_s0 + $0x20] sm:$0xff]  ;;  %v55_v17 = vmul.f32 %v214_v1, %v19_v12  ;;  %v56_v18 = vmul.f32 %v214_v1, %v20_v13  ;;  %v57_v22 = vmul.f32 %v214_v1, %v21_v14  ;;  %v23_v24 = vld [vmem:[%s474_s0 + $0x48] sm:$0xff]  ;;  %v24_v29 = vld [vmem:[%s474_s0 + $0x50] sm:$0xff] }
   0x5   :  { %v54_v11 = vmul.f32 %v214_v1, %v18_v8  ;;  %v86_v15 = vadd.f32 %v219_v2, %v50_v4  ;;  %v87_v16 = vadd.f32 %v219_v2, %v51_v5  ;;  %v88_v19 = vadd.f32 %v219_v2, %v52_v9  ;;  %v22_v23 = vld [vmem:[%s474_s0 + $0x40] sm:$0xff]  ;;  %v25_v30 = vld [vmem:[%s474_s0 + $0x58] sm:$0xff]  ;;  %v27_v35 = vld [vmem:[%s474_s0 + $0x68] sm:$0xff] }
   0x6   :  { %v89_v20 = vadd.f32 %v219_v2, %v53_v10  ;;  %v91_v27 = vadd.f32 %v219_v2, %v55_v17  ;;  %v92_v28 = vadd.f32 %v219_v2, %v56_v18  ;;  %v26_v31 = vld [vmem:[%s474_s0 + $0x60] sm:$0xff]  ;;  %v93_v34 = vadd.f32 %v219_v2, %v57_v22  ;;  %v28_v36 = vld [vmem:[%s474_s0 + $0x70] sm:$0xff]  ;;  %v29_v41 = vld [vmem:[%s474_s0 + $0x78] sm:$0xff] }
   0x7   :  { %v90_v21 = vadd.f32 %v219_v2, %v54_v11  ;;  %v118_v25 = vmax.f32 %v86_v15, 0.0  ;;  %v119_v26 = vmax.f32 %v87_v16, 0.0  ;;  %v120_v32 = vmax.f32 %v88_v19, 0.0  ;;  %v30_v54 = vld [vmem:[%s474_s0 + $0x80] sm:$0xff]  ;;  %v31_v55 = vld [vmem:[%s474_s0 + $0x88] sm:$0xff]  ;;  %v32_v58 = vld [vmem:[%s474_s0 + $0x90] sm:$0xff] }
   0x8   :  { %v121_v33 = vmax.f32 %v89_v20, 0.0  ;;  %v123_v38 = vmax.f32 %v91_v27, 0.0  ;;  %v58_v39 = vmul.f32 %v214_v1, %v22_v23  ;;  %v59_v40 = vmul.f32 %v214_v1, %v23_v24  ;;  %v33_v59 = vld [vmem:[%s474_s0 + $0x98] sm:$0xff]  ;;  %v34_v62 = vld [vmem:[%s474_s0 + $0xa0] sm:$0xff]  ;;  %v35_v5 = vld [vmem:[%s474_s0 + $0xa8] sm:$0xff] }
   0x9   :  { %150 = vst [vmem:[%s477_s3] sm:$0xff] %v118_v25  ;;  %v122_v37 = vmax.f32 %v90_v21, 0.0  ;;  %v124_v42 = vmax.f32 %v92_v28, 0.0  ;;  %v60_v43 = vmul.f32 %v214_v1, %v24_v29  ;;  %v61_v44 = vmul.f32 %v214_v1, %v25_v30  ;;  %v36_v10 = vld [vmem:[%s474_s0 + $0xb0] sm:$0xff]  ;;  %v37_v14 = vld [vmem:[%s474_s0 + $0xb8] sm:$0xff]  ;;  %v38_v18 = vld [vmem:[%s474_s0 + $0xc0] sm:$0xff] }
   0xa   :  { %151 = vst [vmem:[%s477_s3 + $0x8] sm:$0xff] %v119_v26  ;;  %v62_v45 = vmul.f32 %v214_v1, %v26_v31  ;;  %v94_v46 = vadd.f32 %v219_v2, %v58_v39  ;;  %v95_v47 = vadd.f32 %v219_v2, %v59_v40  ;;  %v63_v48 = vmul.f32 %v214_v1, %v27_v35  ;;  %v39_v22 = vld [vmem:[%s474_s0 + $0xc8] sm:$0xff]  ;;  %v40_v26 = vld [vmem:[%s474_s0 + $0xd0] sm:$0xff]  ;;  %v41_v30 = vld [vmem:[%s474_s0 + $0xd8] sm:$0xff] }
   0xb   :  { %152 = vst [vmem:[%s477_s3 + $0x10] sm:$0xff] %v120_v32  ;;  %v64_v49 = vmul.f32 %v214_v1, %v28_v36  ;;  %v125_v50 = vmax.f32 %v93_v34, 0.0  ;;  %v96_v51 = vadd.f32 %v219_v2, %v60_v43  ;;  %v97_v52 = vadd.f32 %v219_v2, %v61_v44  ;;  %v42_v34 = vld [vmem:[%s474_s0 + $0xe0] sm:$0xff] }
   0xc   :  { %153 = vst [vmem:[%s477_s3 + $0x18] sm:$0xff] %v121_v33  ;;  %v65_v53 = vmul.f32 %v214_v1, %v29_v41  ;;  %v126_v56 = vmax.f32 %v94_v46, 0.0  ;;  %v98_v57 = vadd.f32 %v219_v2, %v62_v45  ;;  %v127_v60 = vmax.f32 %v95_v47, 0.0  ;;  %v45_v46 = vld [vmem:[%s474_s0 + $0xf8] sm:$0xff] }
   0xd   :  { %154 = vst [vmem:[%s477_s3 + $0x20] sm:$0xff] %v122_v37  ;;  %v99_v61 = vadd.f32 %v219_v2, %v63_v48  ;;  %v128_v63 = vmax.f32 %v96_v51, 0.0  ;;  %v100_v0 = vadd.f32 %v219_v2, %v64_v49  ;;  %v66_v3 = vmul.f32 %v214_v1, %v30_v54 }
   0xe   :  { %155 = vst [vmem:[%s477_s3 + $0x28] sm:$0xff] %v123_v38  ;;  %v67_v4 = vmul.f32 %v214_v1, %v31_v55  ;;  %v129_v6 = vmax.f32 %v97_v52, 0.0  ;;  %v101_v7 = vadd.f32 %v219_v2, %v65_v53  ;;  %v68_v8 = vmul.f32 %v214_v1, %v32_v58  ;;  %v43_v38 = vld [vmem:[%s474_s0 + $0xe8] sm:$0xff] }
   0xf   :  { %156 = vst [vmem:[%s477_s3 + $0x30] sm:$0xff] %v124_v42  ;;  %v69_v9 = vmul.f32 %v214_v1, %v33_v59  ;;  %v130_v11 = vmax.f32 %v98_v57, 0.0  ;;  %v102_v12 = vadd.f32 %v219_v2, %v66_v3  ;;  %v70_v13 = vmul.f32 %v214_v1, %v34_v62  ;;  %v44_v42 = vld [vmem:[%s474_s0 + $0xf0] sm:$0xff] }
  0x10   :  { %157 = vst [vmem:[%s477_s3 + $0x38] sm:$0xff] %v125_v50  ;;  %v131_v15 = vmax.f32 %v99_v61, 0.0  ;;  %v103_v16 = vadd.f32 %v219_v2, %v67_v4  ;;  %v71_v17 = vmul.f32 %v214_v1, %v35_v5  ;;  %v132_v19 = vmax.f32 %v100_v0, 0.0 }
  0x11   :  { %158 = vst [vmem:[%s477_s3 + $0x40] sm:$0xff] %v126_v56  ;;  %v104_v20 = vadd.f32 %v219_v2, %v68_v8  ;;  %v72_v21 = vmul.f32 %v214_v1, %v36_v10  ;;  %v133_v23 = vmax.f32 %v101_v7, 0.0  ;;  %v105_v24 = vadd.f32 %v219_v2, %v69_v9 }
  0x12   :  { %159 = vst [vmem:[%s477_s3 + $0x48] sm:$0xff] %v127_v60  ;;  %v73_v25 = vmul.f32 %v214_v1, %v37_v14  ;;  %v134_v27 = vmax.f32 %v102_v12, 0.0  ;;  %v106_v28 = vadd.f32 %v219_v2, %v70_v13  ;;  %v74_v29 = vmul.f32 %v214_v1, %v38_v18 }
  0x13   :  { %160 = vst [vmem:[%s477_s3 + $0x50] sm:$0xff] %v128_v63  ;;  %v135_v31 = vmax.f32 %v103_v16, 0.0  ;;  %v107_v32 = vadd.f32 %v219_v2, %v71_v17  ;;  %v75_v33 = vmul.f32 %v214_v1, %v39_v22  ;;  %v136_v35 = vmax.f32 %v104_v20, 0.0 }
  0x14   :  { %161 = vst [vmem:[%s477_s3 + $0x58] sm:$0xff] %v129_v6  ;;  %v108_v36 = vadd.f32 %v219_v2, %v72_v21  ;;  %v76_v37 = vmul.f32 %v214_v1, %v40_v26  ;;  %v137_v39 = vmax.f32 %v105_v24, 0.0  ;;  %v109_v40 = vadd.f32 %v219_v2, %v73_v25 }
  0x15   :  { %162 = vst [vmem:[%s477_s3 + $0x60] sm:$0xff] %v130_v11  ;;  %v77_v41 = vmul.f32 %v214_v1, %v41_v30  ;;  %v138_v43 = vmax.f32 %v106_v28, 0.0  ;;  %v110_v44 = vadd.f32 %v219_v2, %v74_v29  ;;  %v78_v45 = vmul.f32 %v214_v1, %v42_v34 }
  0x16   :  { %163 = vst [vmem:[%s477_s3 + $0x68] sm:$0xff] %v131_v15  ;;  %v139_v47 = vmax.f32 %v107_v32, 0.0  ;;  %v111_v48 = vadd.f32 %v219_v2, %v75_v33  ;;  %v79_v49 = vmul.f32 %v214_v1, %v43_v38  ;;  %v140_v50 = vmax.f32 %v108_v36, 0.0 }
  0x17   :  { %164 = vst [vmem:[%s477_s3 + $0x70] sm:$0xff] %v132_v19  ;;  %v112_v51 = vadd.f32 %v219_v2, %v76_v37  ;;  %v80_v52 = vmul.f32 %v214_v1, %v44_v42  ;;  %v141_v53 = vmax.f32 %v109_v40, 0.0  ;;  %v113_v54 = vadd.f32 %v219_v2, %v77_v41 }
  0x18   :  { %165 = vst [vmem:[%s477_s3 + $0x78] sm:$0xff] %v133_v23  ;;  %v81_v55 = vmul.f32 %v214_v1, %v45_v46  ;;  %v142_v56 = vmax.f32 %v110_v44, 0.0  ;;  %v114_v57 = vadd.f32 %v219_v2, %v78_v45  ;;  %v143_v58 = vmax.f32 %v111_v48, 0.0 }
  0x19   :  { %166 = vst [vmem:[%s477_s3 + $0x80] sm:$0xff] %v134_v27  ;;  %v115_v59 = vadd.f32 %v219_v2, %v79_v49  ;;  %v144_v60 = vmax.f32 %v112_v51, 0.0  ;;  %v116_v1 = vadd.f32 %v219_v2, %v80_v52  ;;  %v145_v61 = vmax.f32 %v113_v54, 0.0 }
  0x1a   :  { %167 = vst [vmem:[%s477_s3 + $0x88] sm:$0xff] %v135_v31  ;;  %v117_v62 = vadd.f32 %v219_v2, %v81_v55  ;;  %v146_v63 = vmax.f32 %v114_v57, 0.0 }
  0x1b   :  { %168 = vst [vmem:[%s477_s3 + $0x90] sm:$0xff] %v136_v35  ;;  %v147_v0 = vmax.f32 %v115_v59, 0.0  ;;  %v148_v3 = vmax.f32 %v116_v1, 0.0 }
  0x1c   :  { %169 = vst [vmem:[%s477_s3 + $0x98] sm:$0xff] %v137_v39  ;;  %v149_v2 = vmax.f32 %v117_v62, 0.0 }
  0x1d   :  { %170 = vst [vmem:[%s477_s3 + $0xa0] sm:$0xff] %v138_v43 }
  0x1e   :  { %171 = vst [vmem:[%s477_s3 + $0xa8] sm:$0xff] %v139_v47 }
  0x1f   :  { %172 = vst [vmem:[%s477_s3 + $0xb0] sm:$0xff] %v140_v50 }
  0x20   :  { %173 = vst [vmem:[%s477_s3 + $0xb8] sm:$0xff] %v141_v53 }
  0x21   :  { %174 = vst [vmem:[%s477_s3 + $0xc0] sm:$0xff] %v142_v56 }
  0x22   :  { %175 = vst [vmem:[%s477_s3 + $0xc8] sm:$0xff] %v143_v58 }
  0x23   :  { %176 = vst [vmem:[%s477_s3 + $0xd0] sm:$0xff] %v144_v60 }
  0x24   :  { %177 = vst [vmem:[%s477_s3 + $0xd8] sm:$0xff] %v145_v61 }
  0x25   :  { %178 = vst [vmem:[%s477_s3 + $0xe0] sm:$0xff] %v146_v63 }
  0x26   :  { %179 = vst [vmem:[%s477_s3 + $0xe8] sm:$0xff] %v147_v0 }
  0x27   :  { %180 = vst [vmem:[%s477_s3 + $0xf0] sm:$0xff] %v148_v3 }
  0x28   :  { %181 = vst [vmem:[%s477_s3 + $0xf8] sm:$0xff] %v149_v2 }

// kernel: gcn_block_forward.2
= control target key start
LH: loop header
LB: loop body
LE: loop exit
PB: predicated region body
PF: predicated region fallthrough
CT: control target
= control target key end

     0   :  { %s1057_s15 = smov 0   ;;  %s1059_s16 = smov 0   ;;  %s1277_s0 = inlined_call_operand.vmem [shape: bf16[256,256], index: 0, kind: input, shape index: {}]   ;;  %s1278_s1 = inlined_call_operand.vmem [shape: bf16[256,128], index: 1, kind: input, shape index: {}]   ;;  %s1279_s2 = inlined_call_operand.vmem [shape: f32[256,128], index: 2, kind: output, shape index: {0}]   ;;  %s1280_s3 = inlined_call_operand.vmem [shape: f32[2,1,128], index: 3, kind: output, shape index: {1}]   ;;  %s1281_s4 = inlined_call_operand.vmem [shape: f32[2,1,128], index: 4, kind: output, shape index: {2}]  }
   0x1   :  { %s1061_s17 = smov 0   ;;  %s1063_s18 = smov 0  }
   0x2   :  { %s1065_s19 = smov 0   ;;  %s1067_s20 = smov 0  }
   0x3   :  { %s1069_s21 = smov 0  }
   0x4 LB: > { %s24_s22 = sadd.s32 1, %s1021_s19  ;;  %s27_s23 = sadd.s32 1, %s1025_s20  ;;  %s1029_s21 = sphi %s1069_s21, %s15_s21   ;;  %s1025_s20 = sphi %s1067_s20, %s1287_s20   ;;  %s1021_s19 = sphi %s1065_s19, %s1286_s19   ;;  %s1017_s18 = sphi %s1063_s18, %s1285_s18   ;;  %s1013_s17 = sphi %s1061_s17, %s1284_s17   ;;  %s1009_s16 = sphi %s1059_s16, %s1283_s16   ;;  %s1005_s15 = sphi %s1057_s15, %s1282_s15  }
   0x5   : > { %p25_p0 = scmp.ge.s32.totalorder %s24_s22, 2  ;;  %p43_p1 = scmp.ne.s32.totalorder %s1009_s16, %s1005_s15 }
   0x6   : > { %p44_p2 = scmp.eq.s32.totalorder %s1029_s21, 0  ;;  %s36_s27 = sadd.s32 1, %s1009_s16 }
   0x7   : > { %s1289_s22 = smov (%p25_p0, %s24_s22), 0  ;;  %s1291_s23 = smov (!%p25_p0, %s27_s23), %s1025_s20 }
   0x8   : > { %p45_p3 = por %p44_p2, %p43_p1  ;;  %p29_p4 = scmp.ge.s32.totalorder %s1291_s23, 2 }
   0x9   : > { %s32_s24 = ssub.s32 %s1021_s19, %s1289_s22  ;;  %p798_p6 = scmp.ge.s32.totalorder %s1029_s21, 4 }
   0xa   : > { %s1293_s23 = smov (%p29_p4, %s1291_s23), 0 }
   0xb   : > { %s31_s25 = ssub.s32 %s1025_s20, %s1293_s23  ;;  %171 = sbr.rel (%p798_p6) target bundleno = 38 (0x26), region = 20 }
   0xc   : > { %s33_s26 = sor.u32 %s32_s24, %s31_s25 }
   0xd   : > { %p34_p5 = scmp.eq.s32.totalorder %s33_s26, 0 }
   0xf   : > { %s1108_s28 = scalar_select %p34_p5, %s1009_s16, %s36_s27  }
  0x10   : > { %174 = sbr.rel (!%p45_p3) target bundleno = 38 (0x26), region = 24  ;;  %s176_s29 = sand.u32 (%p45_p3), 1, %s1009_s16  }
  0x11   : > { %s877_s30 = sshll.u32 (%p45_p3), %s1025_s20, 5  ;;  %s799_s5 = sshll.u32 (%p45_p3), %s176_s29, 6 }
  0x12   : > { %s181_s6 = sadd.s32 (%p45_p3), %s1021_s19, %s877_s30  ;;  %s178_s11 = scalar_lea.vmem (%p45_p3), [#allocation2], %s799_s5 }
  0x13   : > { %s802_s7 = sshll.u32 (%p45_p3), %s181_s6, 2 }
  0x14   : > { %s1117_s10 = scalar_lea.vmem (%p45_p3), %s1277_s0, %s802_s7 }
  0x15   : > { %v200_v0 = vld [vmem:[%s1117_s10] sm:$0xf]  ;;  %v202_v1 = vld [vmem:[%s1117_s10 + $0x8] sm:$0xf]  ;;  %v204_v2 = vld [vmem:[%s1117_s10 + $0x10] sm:$0xf] }
  0x16   : > { %201 = vst [vmem:[%s178_s11] sm:$0xf] %v200_v0  ;;  %v206_v3 = vld [vmem:[%s1117_s10 + $0x18] sm:$0xf]  ;;  %v208_v4 = vld [vmem:[%s1117_s10 + $0x20] sm:$0xf] }
  0x17   : > { %203 = vst [vmem:[%s178_s11 + $0x4] sm:$0xf] %v202_v1  ;;  %v210_v5 = vld [vmem:[%s1117_s10 + $0x28] sm:$0xf]  ;;  %v212_v6 = vld [vmem:[%s1117_s10 + $0x30] sm:$0xf] }
  0x18   : > { %205 = vst [vmem:[%s178_s11 + $0x8] sm:$0xf] %v204_v2  ;;  %v214_v7 = vld [vmem:[%s1117_s10 + $0x38] sm:$0xf]  ;;  %v216_v8 = vld [vmem:[%s1117_s10 + $0x40] sm:$0xf] }
  0x19   : > { %207 = vst [vmem:[%s178_s11 + $0xc] sm:$0xf] %v206_v3  ;;  %v218_v9 = vld [vmem:[%s1117_s10 + $0x48] sm:$0xf]  ;;  %v220_v10 = vld [vmem:[%s1117_s10 + $0x50] sm:$0xf] }
  0x1a   : > { %209 = vst [vmem:[%s178_s11 + $0x10] sm:$0xf] %v208_v4  ;;  %v222_v11 = vld [vmem:[%s1117_s10 + $0x58] sm:$0xf]  ;;  %v224_v12 = vld [vmem:[%s1117_s10 + $0x60] sm:$0xf] }
  0x1b   : > { %211 = vst [vmem:[%s178_s11 + $0x14] sm:$0xf] %v210_v5  ;;  %v226_v13 = vld [vmem:[%s1117_s10 + $0x68] sm:$0xf]  ;;  %v228_v14 = vld [vmem:[%s1117_s10 + $0x70] sm:$0xf] }
  0x1c   : > { %213 = vst [vmem:[%s178_s11 + $0x18] sm:$0xf] %v212_v6  ;;  %v230_v15 = vld [vmem:[%s1117_s10 + $0x78] sm:$0xf] }
  0x1d   : > { %215 = vst [vmem:[%s178_s11 + $0x1c] sm:$0xf] %v214_v7 }
  0x1e   : > { %217 = vst [vmem:[%s178_s11 + $0x20] sm:$0xf] %v216_v8 }
  0x1f   : > { %219 = vst [vmem:[%s178_s11 + $0x24] sm:$0xf] %v218_v9 }
  0x20   : > { %221 = vst [vmem:[%s178_s11 + $0x28] sm:$0xf] %v220_v10 }
  0x21   : > { %223 = vst [vmem:[%s178_s11 + $0x2c] sm:$0xf] %v222_v11 }
  0x22   : > { %225 = vst [vmem:[%s178_s11 + $0x30] sm:$0xf] %v224_v12 }
  0x23   : > { %227 = vst [vmem:[%s178_s11 + $0x34] sm:$0xf] %v226_v13 }
  0x24   : > { %229 = vst [vmem:[%s178_s11 + $0x38] sm:$0xf] %v228_v14 }
  0x25   : > { %231 = vst [vmem:[%s178_s11 + $0x3c] sm:$0xf] %v230_v15 }
  0x26 PF: > { %p803_p7 = scmp.ge.s32.totalorder %s1029_s21, 1  ;;  %p286_p8 = scmp.lt.s32.totalorder %s1029_s21, 5 }
  0x28   : > { %p287_p9 = pnand %p803_p7, %p286_p8 }
  0x29   : > { %s293_s12 = sand.u32 (!%p287_p9), 1, %s1005_s15   ;;  %s805_s13 = sshll.u32 (!%p287_p9), %s1017_s18, 4 }
  0x2a   : > { %290 = sbr.rel (%p287_p9) target bundleno = 315 (0x13b), region = 65  ;;  %s804_s14 = sshll.u32 (!%p287_p9), %s293_s12, 6 }
  0x2b   : > { %p326_p10 = scmp.lt.s32.totalorder (!%p287_p9), %s805_s13, 31  ;;  %p331_p11 = scmp.lt.s32.totalorder (!%p287_p9), %s1017_s18, 1 }
  0x2c   : > { %s1156_s8 = scalar_lea.vmem (!%p287_p9), [#allocation2], %s804_s14  ;;  %p807_p12 = scmp.ne.s32.totalorder (!%p287_p9), %s1013_s17, 0 }
  0x2f   : > { %s1295_s13 = smov (!%p326_p10, %s805_s13), 31  ;;  %s1297_s18 = smov (!%p331_p11, %s1017_s18), 1 }
  0x30   : > { %s806_s24 = sshll.u32 %s1295_s13, 3  ;;  %s333_s5 = scalar_lea.vmem %s1280_s3, %s1297_s18 }
  0x31   : > { %s1146_s27 = scalar_lea.vmem %s1279_s2, %s806_s24  ;;  %s336_s7 = scalar_lea.vmem %s1281_s4, %s1297_s18 }
  0x32   : > { %340 = sbr.rel (%p807_p12) target bundleno = 72 (0x48), region = 73 }
  0x37   : > { %v1031_v16 = vmov 0.0  }
  0x38   : > { %341 = vst [vmem:[%s1146_s27] sm:$0xff] %v1031_v16 }
  0x39   : > { %342 = vst [vmem:[%s1146_s27 + $0x8] sm:$0xff] %v1031_v16 }
  0x3a   : > { %343 = vst [vmem:[%s1146_s27 + $0x10] sm:$0xff] %v1031_v16 }
  0x3b   : > { %344 = vst [vmem:[%s1146_s27 + $0x18] sm:$0xff] %v1031_v16 }
  0x3c   : > { %345 = vst [vmem:[%s1146_s27 + $0x20] sm:$0xff] %v1031_v16 }
  0x3d   : > { %346 = vst [vmem:[%s1146_s27 + $0x28] sm:$0xff] %v1031_v16 }
  0x3e   : > { %347 = vst [vmem:[%s1146_s27 + $0x30] sm:$0xff] %v1031_v16 }
  0x3f   : > { %348 = vst [vmem:[%s1146_s27 + $0x38] sm:$0xff] %v1031_v16 }
  0x40   : > { %349 = vst [vmem:[%s1146_s27 + $0x40] sm:$0xff] %v1031_v16 }
  0x41   : > { %350 = vst [vmem:[%s1146_s27 + $0x48] sm:$0xff] %v1031_v16 }
  0x42   : > { %351 = vst [vmem:[%s1146_s27 + $0x50] sm:$0xff] %v1031_v16 }
  0x43   : > { %352 = vst [vmem:[%s1146_s27 + $0x58] sm:$0xff] %v1031_v16 }
  0x44   : > { %353 = vst [vmem:[%s1146_s27 + $0x60] sm:$0xff] %v1031_v16 }
  0x45   : > { %354 = vst [vmem:[%s1146_s27 + $0x68] sm:$0xff] %v1031_v16 }
  0x46   : > { %355 = vst [vmem:[%s1146_s27 + $0x70] sm:$0xff] %v1031_v16 }
  0x47   : > { %356 = vst [vmem:[%s1146_s27 + $0x78] sm:$0xff] %v1031_v16 }
  0x48 PF: > { %s808_s9 = sshll.u32 %s1013_s17, 7  ;;  %v886_v25 = vld [vmem:[%s1156_s8] sm:$0xff]  ;;  %v888_v26 = vld [vmem:[%s1156_s8 + $0x10] sm:$0xff]  ;;  %v887_v29 = vld [vmem:[%s1156_s8 + $0x8] sm:$0xff]  ;;  %p874_p13 = scmp.ne.s32.totalorder %s1013_s17, 1 }
  0x49   : > { %s358_s10 = sshra.s32 %s808_s9, 3  ;;  %v890_v27 = vld [vmem:[%s1156_s8 + $0x20] sm:$0xff]  ;;  %v892_v28 = vld [vmem:[%s1156_s8 + $0x30] sm:$0xff]  ;;  %v889_v30 = vld [vmem:[%s1156_s8 + $0x18] sm:$0xff] }
  0x4a   : > { %s809_s11 = sshll.u32 %s358_s10, 2  ;;  %v891_v31 = vld [vmem:[%s1156_s8 + $0x28] sm:$0xff]  ;;  %v893_v32 = vld [vmem:[%s1156_s8 + $0x38] sm:$0xff]  ;;  %v378_v33 = vld [vmem:[%s1146_s27] sm:$0xff] }
  0x4b   : > { %s1179_s14 = scalar_lea.vmem %s1278_s1, %s809_s11  ;;  %v382_v34 = vld [vmem:[%s1146_s27 + $0x20] sm:$0xff]  ;;  %v379_v41 = vld [vmem:[%s1146_s27 + $0x8] sm:$0xff]  ;;  %v380_v53 = vld [vmem:[%s1146_s27 + $0x10] sm:$0xff] }
  0x4c   : > { %v885_v17 = vld [vmem:[%s1179_s14 + $0x38] sm:$0xff]  ;;  %v884_v18 = vld [vmem:[%s1179_s14 + $0x30] sm:$0xff]  ;;  %v883_v19 = vld [vmem:[%s1179_s14 + $0x28] sm:$0xff] }
  0x4d   : > { %506 = vmatpush.bf16.msra.mxu0 %v885_v17  ;;  %894 = vmatpush.bf16.msra.mxu1 %v885_v17  ;;  %v882_v20 = vld [vmem:[%s1179_s14 + $0x20] sm:$0xff]  ;;  %v881_v21 = vld [vmem:[%s1179_s14 + $0x18] sm:$0xff]  ;;  %v880_v22 = vld [vmem:[%s1179_s14 + $0x10] sm:$0xff] }
  0x4e   : > { %895 = vmatpush.bf16.msra.mxu2 %v885_v17  ;;  %896 = vmatpush.bf16.msra.mxu3 %v885_v17  ;;  %v879_v23 = vld [vmem:[%s1179_s14 + $0x8] sm:$0xff]  ;;  %v878_v24 = vld [vmem:[%s1179_s14] sm:$0xff]  ;;  %v384_v54 = vld [vmem:[%s1146_s27 + $0x30] sm:$0xff] }
  0x4f   : > { %v386_v39 = vld [vmem:[%s1146_s27 + $0x40] sm:$0xff]  ;;  %v383_v42 = vld [vmem:[%s1146_s27 + $0x28] sm:$0xff]  ;;  %v388_v63 = vld [vmem:[%s1146_s27 + $0x50] sm:$0xff] }
  0x50   : > { %v390_v40 = vld [vmem:[%s1146_s27 + $0x60] sm:$0xff]  ;;  %v387_v51 = vld [vmem:[%s1146_s27 + $0x48] sm:$0xff]  ;;  %v392_v0 = vld [vmem:[%s1146_s27 + $0x70] sm:$0xff] }
  0x51   : > { %507 = vmatpush.bf16.msra.mxu0 %v884_v18  ;;  %897 = vmatpush.bf16.msra.mxu1 %v884_v18  ;;  %v391_v52 = vld [vmem:[%s1146_s27 + $0x68] sm:$0xff]  ;;  %v381_v1 = vld [vmem:[%s1146_s27 + $0x18] sm:$0xff] }
  0x52   : > { %898 = vmatpush.bf16.msra.mxu2 %v884_v18  ;;  %899 = vmatpush.bf16.msra.mxu3 %v884_v18  ;;  %v385_v2 = vld [vmem:[%s1146_s27 + $0x38] sm:$0xff] }
  0x53   : > { %v389_v11 = vld [vmem:[%s1146_s27 + $0x58] sm:$0xff] }
  0x54   : > { %v393_v12 = vld [vmem:[%s1146_s27 + $0x78] sm:$0xff] }
  0x55   : > { %508 = vmatpush.bf16.msra.mxu0 %v883_v19  ;;  %900 = vmatpush.bf16.msra.mxu1 %v883_v19 }
  0x56   : > { %901 = vmatpush.bf16.msra.mxu2 %v883_v19  ;;  %902 = vmatpush.bf16.msra.mxu3 %v883_v19 }
  0x59   : > { %509 = vmatpush.bf16.msra.mxu0 %v882_v20  ;;  %903 = vmatpush.bf16.msra.mxu1 %v882_v20 }
  0x5a   : > { %904 = vmatpush.bf16.msra.mxu2 %v882_v20  ;;  %905 = vmatpush.bf16.msra.mxu3 %v882_v20 }
  0x5d   : > { %510 = vmatpush.bf16.msra.mxu0 %v881_v21  ;;  %906 = vmatpush.bf16.msra.mxu1 %v881_v21 }
  0x5e   : > { %907 = vmatpush.bf16.msra.mxu2 %v881_v21  ;;  %908 = vmatpush.bf16.msra.mxu3 %v881_v21 }
  0x61   : > { %511 = vmatpush.bf16.msra.mxu0 %v880_v22  ;;  %909 = vmatpush.bf16.msra.mxu1 %v880_v22 }
  0x62   : > { %910 = vmatpush.bf16.msra.mxu2 %v880_v22  ;;  %911 = vmatpush.bf16.msra.mxu3 %v880_v22 }
  0x65   : > { %512 = vmatpush.bf16.msra.mxu0 %v879_v23  ;;  %912 = vmatpush.bf16.msra.mxu1 %v879_v23 }
  0x66   : > { %913 = vmatpush.bf16.msra.mxu2 %v879_v23  ;;  %914 = vmatpush.bf16.msra.mxu3 %v879_v23 }
  0x69   : > { %513 = vmatpush.bf16.msra.mxu0 %v878_v24  ;;  %915 = vmatpush.bf16.msra.mxu1 %v878_v24 }
  0x6a   : > { %916 = vmatpush.bf16.msra.mxu2 %v878_v24  ;;  %917 = vmatpush.bf16.msra.mxu3 %v878_v24 }
  0x6c   : > { %514 = vmatmul.bf16.vlgmr.msra.gmra.mxu0 %v886_v25  ;;  %524 = vmatmul.bf16.vlgmr.msra.gmra.mxu1 %v888_v26 }
  0x6d   : > { %534 = vmatmul.bf16.vlgmr.msra.gmra.mxu2 %v890_v27  ;;  %544 = vmatmul.bf16.vlgmr.msra.gmra.mxu3 %v892_v28 }
  0x7c   : > { %519 = vmatmul.bf16.gmra.mxu0 %v887_v29  ;;  %529 = vmatmul.bf16.gmra.mxu1 %v889_v30 }
  0x7d   : > { %539 = vmatmul.bf16.gmra.mxu2 %v891_v31  ;;  %549 = vmatmul.bf16.gmra.mxu3 %v893_v32 }
  0xe9   : > { %v515_v35 = vpop.f32.mrf.mxu0  ;;  %v525_v36 = vpop.f32.mrf.mxu1 }
  0xea   : > { %v555_v37 = vadd.f32 %v515_v35, %v378_v33  ;;  %v559_v38 = vadd.f32 %v525_v36, %v382_v34 }
  0xec   : > { %571 = vst [vmem:[%s1146_s27] sm:$0xff] %v555_v37 }
  0xed   : > { %575 = vst [vmem:[%s1146_s27 + $0x20] sm:$0xff] %v559_v38 }
  0xf0   : > { %v535_v43 = vpop.f32.mrf.mxu2  ;;  %v545_v44 = vpop.f32.mrf.mxu3 }
  0xf1   : > { %v563_v45 = vadd.f32 %v535_v43, %v386_v39  ;;  %v567_v46 = vadd.f32 %v545_v44, %v390_v40  ;;  %v517_v47 = vpop.f32.mrf.mxu0  ;;  %v527_v48 = vpop.f32.mrf.mxu1 }
  0xf2   : > { %v556_v49 = vadd.f32 %v517_v47, %v379_v41  ;;  %v560_v50 = vadd.f32 %v527_v48, %v383_v42 }
  0xf3   : > { %579 = vst [vmem:[%s1146_s27 + $0x40] sm:$0xff] %v563_v45 }
  0xf4   : > { %583 = vst [vmem:[%s1146_s27 + $0x60] sm:$0xff] %v567_v46 }
  0xf5   : > { %572 = vst [vmem:[%s1146_s27 + $0x8] sm:$0xff] %v556_v49 }
  0xf6   : > { %576 = vst [vmem:[%s1146_s27 + $0x28] sm:$0xff] %v560_v50 }
  0xf8   : > { %v537_v55 = vpop.f32.mrf.mxu2  ;;  %v547_v56 = vpop.f32.mrf.mxu3 }
  0xf9   : > { %v564_v57 = vadd.f32 %v537_v55, %v387_v51  ;;  %v568_v58 = vadd.f32 %v547_v56, %v391_v52  ;;  %v520_v59 = vpop.f32.mrf.mxu0  ;;  %v530_v60 = vpop.f32.mrf.mxu1 }
  0xfa   : > { %v557_v61 = vadd.f32 %v520_v59, %v380_v53  ;;  %v561_v62 = vadd.f32 %v530_v60, %v384_v54 }
  0xfb   : > { %580 = vst [vmem:[%s1146_s27 + $0x48] sm:$0xff] %v564_v57 }
  0xfc   : > { %584 = vst [vmem:[%s1146_s27 + $0x68] sm:$0xff] %v568_v58 }
  0xfd   : > { %573 = vst [vmem:[%s1146_s27 + $0x10] sm:$0xff] %v557_v61 }
  0xfe   : > { %577 = vst [vmem:[%s1146_s27 + $0x30] sm:$0xff] %v561_v62 }
 0x100   : > { %v540_v3 = vpop.f32.mrf.mxu2  ;;  %v550_v4 = vpop.f32.mrf.mxu3 }
 0x101   : > { %v565_v5 = vadd.f32 %v540_v3, %v388_v63  ;;  %v569_v6 = vadd.f32 %v550_v4, %v392_v0  ;;  %v522_v7 = vpop.f32.mrf.mxu0  ;;  %v532_v8 = vpop.f32.mrf.mxu1 }
 0x102   : > { %v558_v9 = vadd.f32 %v522_v7, %v381_v1  ;;  %v562_v10 = vadd.f32 %v532_v8, %v385_v2 }
 0x103   : > { %581 = vst [vmem:[%s1146_s27 + $0x50] sm:$0xff] %v565_v5 }
 0x104   : > { %585 = vst [vmem:[%s1146_s27 + $0x70] sm:$0xff] %v569_v6 }
 0x105   : > { %574 = vst [vmem:[%s1146_s27 + $0x18] sm:$0xff] %v558_v9 }
 0x106   : > { %578 = vst [vmem:[%s1146_s27 + $0x38] sm:$0xff] %v562_v10 }
 0x108   : > { %v542_v13 = vpop.f32.mrf.mxu2  ;;  %v552_v14 = vpop.f32.mrf.mxu3  ;;  %590 = sbr.rel (%p874_p13) target bundleno = 315 (0x13b), region = 77 }
 0x109   : > { %v566_v15 = vadd.f32 %v542_v13, %v389_v11  ;;  %v570_v16 = vadd.f32 %v552_v14, %v393_v12 }
 0x10b   : > { %582 = vst [vmem:[%s1146_s27 + $0x58] sm:$0xff] %v566_v15 }
 0x10c   : > { %586 = vst [vmem:[%s1146_s27 + $0x78] sm:$0xff] %v570_v16 }
 0x10d   : > { %v591_v17 = vld [vmem:[%s1146_s27] sm:$0xff]  ;;  %v592_v18 = vld [vmem:[%s1146_s27 + $0x8] sm:$0xff]  ;;  %v593_v19 = vld [vmem:[%s1146_s27 + $0x10] sm:$0xff] }
 0x10e   : > { %v594_v20 = vld [vmem:[%s1146_s27 + $0x18] sm:$0xff]  ;;  %v607_v21 = vadd.f32 %v592_v18, %v591_v17  ;;  %v629_v22 = vmul.f32 %v591_v17, %v591_v17  ;;  %v630_v23 = vmul.f32 %v592_v18, %v592_v18  ;;  %v631_v24 = vmul.f32 %v593_v19, %v593_v19  ;;  %v595_v25 = vld [vmem:[%s1146_s27 + $0x20] sm:$0xff]  ;;  %v596_v29 = vld [vmem:[%s1146_s27 + $0x28] sm:$0xff] }
 0x10f   : > { %v632_v27 = vmul.f32 %v594_v20, %v594_v20  ;;  %v633_v31 = vmul.f32 %v595_v25, %v595_v25  ;;  %v597_v33 = vld [vmem:[%s1146_s27 + $0x30] sm:$0xff]  ;;  %v634_v35 = vmul.f32 %v596_v29, %v596_v29  ;;  %v598_v37 = vld [vmem:[%s1146_s27 + $0x38] sm:$0xff]  ;;  %v599_v41 = vld [vmem:[%s1146_s27 + $0x40] sm:$0xff] }
 0x110   : > { %v608_v26 = vadd.f32 %v607_v21, %v593_v19  ;;  %v645_v28 = vadd.f32 %v630_v23, %v629_v22  ;;  %v635_v39 = vmul.f32 %v597_v33, %v597_v33  ;;  %v636_v43 = vmul.f32 %v598_v37, %v598_v37  ;;  %v600_v45 = vld [vmem:[%s1146_s27 + $0x48] sm:$0xff]  ;;  %v601_v49 = vld [vmem:[%s1146_s27 + $0x50] sm:$0xff]  ;;  %v603_v57 = vld [vmem:[%s1146_s27 + $0x60] sm:$0xff] }
 0x111   : > { %v637_v47 = vmul.f32 %v599_v41, %v599_v41  ;;  %v638_v51 = vmul.f32 %v600_v45, %v600_v45  ;;  %v639_v55 = vmul.f32 %v601_v49, %v601_v49  ;;  %v604_v61 = vld [vmem:[%s1146_s27 + $0x68] sm:$0xff]  ;;  %v641_v63 = vmul.f32 %v603_v57, %v603_v57  ;;  %v605_v1 = vld [vmem:[%s1146_s27 + $0x70] sm:$0xff] }
 0x112   : > { %v609_v30 = vadd.f32 %v608_v26, %v594_v20  ;;  %v646_v32 = vadd.f32 %v645_v28, %v631_v24  ;;  %v602_v53 = vld [vmem:[%s1146_s27 + $0x58] sm:$0xff]  ;;  %v642_v3 = vmul.f32 %v604_v61, %v604_v61  ;;  %v643_v7 = vmul.f32 %v605_v1, %v605_v1 }
 0x113   : > { %v640_v59 = vmul.f32 %v602_v53, %v602_v53  ;;  %v606_v5 = vld [vmem:[%s1146_s27 + $0x78] sm:$0xff] }
 0x114   : > { %v610_v34 = vadd.f32 %v609_v30, %v595_v25  ;;  %v647_v36 = vadd.f32 %v646_v32, %v632_v27  ;;  %v644_v10 = vmul.f32 %v606_v5, %v606_v5 }
 0x116   : > { %v611_v38 = vadd.f32 %v610_v34, %v596_v29  ;;  %v648_v40 = vadd.f32 %v647_v36, %v633_v31 }
 0x118   : > { %v612_v42 = vadd.f32 %v611_v38, %v597_v33  ;;  %v649_v44 = vadd.f32 %v648_v40, %v634_v35 }
 0x11a   : > { %v613_v46 = vadd.f32 %v612_v42, %v598_v37  ;;  %v650_v48 = vadd.f32 %v649_v44, %v635_v39 }
 0x11c   : > { %v614_v50 = vadd.f32 %v613_v46, %v599_v41  ;;  %v651_v52 = vadd.f32 %v650_v48, %v636_v43 }
 0x11e   : > { %v615_v54 = vadd.f32 %v614_v50, %v600_v45  ;;  %v652_v56 = vadd.f32 %v651_v52, %v637_v47 }
 0x120   : > { %v616_v58 = vadd.f32 %v615_v54, %v601_v49  ;;  %v653_v60 = vadd.f32 %v652_v56, %v638_v51 }
 0x122   : > { %v617_v62 = vadd.f32 %v616_v58, %v602_v53  ;;  %v654_v0 = vadd.f32 %v653_v60, %v639_v55 }
 0x124   : > { %v618_v2 = vadd.f32 %v617_v62, %v603_v57  ;;  %v655_v4 = vadd.f32 %v654_v0, %v640_v59 }
 0x126   : > { %v619_v6 = vadd.f32 %v618_v2, %v604_v61  ;;  %v656_v8 = vadd.f32 %v655_v4, %v641_v63 }
 0x128   : > { %v620_v9 = vadd.f32 %v619_v6, %v605_v1  ;;  %v657_v11 = vadd.f32 %v656_v8, %v642_v3 }
 0x12a   : > { %v621_v12 = vadd.f32 %v620_v9, %v606_v5  ;;  %v658_v13 = vadd.f32 %v657_v11, %v643_v7 }
 0x12c   : > { %v622_v14 = vrot.slane %v621_v12, 4  ;;  %v659_v15 = vadd.f32 %v658_v13, %v644_v10 }
 0x12e   : > { %v623_v16 = vadd.f32 %v622_v14, %v621_v12  ;;  %v660_v17 = vrot.slane %v659_v15, 4 }
 0x130   : > { %v624_v18 = vrot.slane %v623_v16, 2  ;;  %v661_v19 = vadd.f32 %v660_v17, %v659_v15 }
 0x132   : > { %v625_v20 = vadd.f32 %v624_v18, %v623_v16  ;;  %v662_v21 = vrot.slane %v661_v19, 2 }
 0x134   : > { %v626_v22 = vrot.slane %v625_v20, 1  ;;  %v663_v23 = vadd.f32 %v662_v21, %v661_v19 }
 0x136   : > { %v627_v24 = vadd.f32 %v626_v22, %v625_v20  ;;  %v664_v25 = vrot.slane %v663_v23, 1 }
 0x138   : > { %628 = vst [vmem:[%s333_s5] sm:$0x1] %v627_v24  ;;  %v665_v26 = vadd.f32 %v664_v25, %v663_v23 }
 0x13a   : > { %666 = vst [vmem:[%s336_s7] sm:$0x1] %v665_v26 }
 0x13b PF: > { %s15_s21 = sadd.s32 1, %s1029_s21   ;;  %s1282_s15 = smov %s1009_s16 }
 0x13c   : > { %p12_p0 = scmp.ge.s32.totalorder %s15_s21, 6   ;;  %s1283_s16 = smov %s1108_s28 }
 0x13d   : > { %s1284_s17 = smov %s1021_s19  ;;  %s1285_s18 = smov %s1025_s20 }
 0x13e   : > { %s1286_s19 = smov %s1289_s22  ;;  %s1287_s20 = smov %s1293_s23 }
 0x13f   :  { %14 = sbr.rel (!%p12_p0) target bundleno = 4 (0x4), region = 137 }

</bundles_post_ra>
